<compile_context>
chip_gen: v7x
topology: tpu7x:2x2x1
jax: 0.10.0
libtpu: 0.0.40
codegen_flags: <defaults>
</compile_context>

<pallas_src>
import math

import jax
import jax.numpy as jnp
from jax.experimental import pallas as pl
from jax.experimental.pallas import tpu as pltpu


def _vmem_capacity_bytes():
    """Physical VMEM per TensorCore; falls back to the v7x 64 MiB (the most
    conservative of the supported parts) if the query is unavailable."""
    try:
        cap = getattr(pltpu.get_tpu_info(), "vmem_capacity_bytes", None)
        if cap:
            return int(cap)
    except Exception:
        pass
    return 64 * 1024 * 1024


def _fit(dim, quantum, limit, max_search=4096):
    """Largest legal tile for `dim`: the full dim, or a multiple of `quantum`
    bounded by max(limit, quantum).  Prefers a tile that divides `dim` evenly
    (searched within 2x below the budgeted size) so no masked edge blocks are
    produced and per-core work stays balanced."""
    if dim <= limit or dim <= quantum:
        return dim
    base = max(quantum, (limit // quantum) * quantum)
    lo = max(quantum, base // 2)
    k, steps = base // quantum, 0
    while k * quantum >= lo and steps < max_search:
        cand = k * quantum
        if dim % cand == 0:
            return cand
        k -= 1
        steps += 1
    return base


def _swap_kernel(kperm):
    def kernel(x_ref, o_ref):
        o_ref[...] = jnp.transpose(x_ref[...], kperm)
    return kernel


def pallas_transpose(x, dim_a, dim_b):
    """Equivalent of torch `x.transpose(dim_a, dim_b).contiguous()`."""
    nd = x.ndim
    a, b = dim_a % nd, dim_b % nd
    if a == b:
        return x                                   # identity; already contiguous
    if a > b:
        a, b = b, a
    perm = list(range(nd))
    perm[a], perm[b] = perm[b], perm[a]
    out_shape = tuple(x.shape[p] for p in perm)

    P = math.prod(x.shape[:a])
    A = x.shape[a]
    M = math.prod(x.shape[a + 1:b])
    B = x.shape[b]
    T = math.prod(x.shape[b + 1:])

    if x.size == 0 or A == 1 or B == 1:
        # Swapping a size-1 axis (or an empty tensor) never moves data.
        return jnp.reshape(x, out_shape)

    # ---- canonical form (P, A, M, B, T), unit groups dropped ----------------
    groups = [(n, s) for n, s in
              (("P", P), ("A", A), ("M", M), ("B", B), ("T", T))
              if n in ("A", "B") or s > 1]
    names = [n for n, _ in groups]
    in_dims = tuple(s for _, s in groups)
    rank = len(in_dims)
    ia, ib = names.index("A"), names.index("B")
    gperm = list(range(rank))
    gperm[ia], gperm[ib] = gperm[ib], gperm[ia]
    gperm = tuple(gperm)
    out_names = [names[p] for p in gperm]
    out_dims = tuple(in_dims[p] for p in gperm)

    # ---- generation-aware block budget ---------------------------------------
    itemsize = jnp.dtype(x.dtype).itemsize
    vmem_cap = _vmem_capacity_bytes()
    # ~8 MiB blocks on 128 MiB VMEM parts (v5e/v6e), ~4 MiB on 64 MiB (v7x);
    # footprint is ~4 blocks (double-buffered in + out) plus headroom.
    block_bytes = int(min(8 << 20, max(2 << 20, vmem_cap // 16)))
    budget = max(1, block_bytes // itemsize)       # elements per block
    sub_q = max(8, 32 // itemsize)                 # sublane quantum: 8/16/32
    has_T = "T" in names
    tile = {}

    if has_T:
        # Lane axis untouched: keep T as wide as possible (lane-dense loads and
        # contiguous HBM bursts), tile the swapped axes on sublane quanta.
        tile["T"] = _fit(T, 128, max(128, budget // (sub_q * sub_q)))
        tile["B"] = _fit(B, sub_q, max(sub_q, budget // (sub_q * tile["T"])))
        tile["A"] = _fit(A, sub_q, max(sub_q, budget // (tile["B"] * tile["T"])))
        used = tile["A"] * tile["B"] * tile["T"]
        if "M" in names:
            tile["M"] = _fit(M, 1, max(1, budget // used))
            used *= tile["M"]
        quanta = {"P": 1, "A": sub_q, "M": 1, "B": sub_q, "T": 128}
    else:
        # Lane axis is swapped: square-ish multiple-of-128 tiles so the XLU
        # transpose runs on full, unmasked vregs.
        # TODO(synk): a lane swap with a non-unit middle group (perm (0,3,2,1))
        # relies on Mosaic's general transpose lowering; decompose into per-M
        # 2D minor transposes if a future toolchain rejects it.
        per = max(128 * 128, budget // (sub_q if "M" in names else 1))
        side = max(128, (int(per ** 0.5) // 128) * 128)
        tile["B"] = _fit(B, 128, side)
        tile["A"] = _fit(A, 128, max(128, per // tile["B"]))
        tile["B"] = _fit(B, 128, max(tile["B"], per // tile["A"]))
        used = tile["A"] * tile["B"]
        if "M" in names:
            tile["M"] = _fit(M, sub_q, max(sub_q, budget // used))
            used *= tile["M"]
        quanta = {"P": 1, "A": 128, "M": sub_q, "B": 128}
    if "P" in names:
        tile["P"] = _fit(P, 1, max(1, budget // used))

    # ---- megacore: make sure a v7x chip's second TensorCore gets work --------
    def _grid_size():
        return math.prod(pl.cdiv(in_dims[i], tile[names[i]]) for i in range(rank))

    if _grid_size() == 1 and x.size * itemsize >= (1 << 20):
        for n in ("P", "M", "A", "B", "T"):
            if n not in names:
                continue
            d = in_dims[names.index(n)]
            q = quanta[n]
            if d <= q:
                continue
            half = max(q, ((d // 2 + q - 1) // q) * q)   # quantum-aligned half
            if half < d:
                tile[n] = half
                break

    blk_in = tuple(tile[n] for n in names)
    blk_out = tuple(tile[n] for n in out_names)
    kperm = gperm   # swapped groups are always materialized, so block perm == group perm

    # ---- grid: every block is disjoint -> all axes "parallel" ----------------
    grid_axes = [i for i in range(rank) if i not in (ia, ib)] + [ib, ia]
    grid = tuple(pl.cdiv(in_dims[i], blk_in[i]) for i in grid_axes)
    gpos = {axis: g for g, axis in enumerate(grid_axes)}

    def in_index_map(*g):
        return tuple(g[gpos[i]] for i in range(rank))

    def out_index_map(*g):
        return tuple(g[gpos[gperm[j]]] for j in range(rank))

    # Footprint ~= 2 double-buffered input blocks + 2 output blocks (+headroom);
    # cap well inside the physical per-core VMEM of the detected generation.
    blk_bytes_actual = math.prod(blk_in) * itemsize
    vmem_limit = int(min(int(0.9 * vmem_cap),
                         max(32 << 20, 5 * blk_bytes_actual)))

    y = pl.pallas_call(
        _swap_kernel(kperm),
        out_shape=jax.ShapeDtypeStruct(out_dims, x.dtype),
        grid=grid,
        in_specs=[pl.BlockSpec(blk_in, in_index_map)],
        out_specs=pl.BlockSpec(blk_out, out_index_map),
        compiler_params=pltpu.CompilerParams(
            dimension_semantics=("parallel",) * len(grid),
            vmem_limit_bytes=vmem_limit),
        cost_estimate=pl.CostEstimate(
            flops=0, transcendentals=0,
            bytes_accessed=2 * x.size * itemsize),
    )(jnp.reshape(x, in_dims))
    return jnp.reshape(y, out_shape)


class Transpose:
    """Mirror of the PyTorch module's interface."""

    def __init__(self, dim_a, dim_b, **kwargs):
        self._dim_a = dim_a
        self._dim_b = dim_b

    def __call__(self, x):
        return pallas_transpose(x, self._dim_a, self._dim_b)


if __name__ == "__main__":
    key = jax.random.PRNGKey(0)
    x = jax.random.normal(key, (2, 4, 16, 16), dtype=jnp.float32)  # N, C, H, W

    cases = [
        (1, 2),    # (N,C,H,W) -> (N,H,C,W): sublane-group swap, lanes untouched
        (2, 3),    # (N,C,H,W) -> (N,C,W,H): lane-axis (XLU) transpose
        (0, 2),    # swap involving the leading axis (middle group present)
        (0, 1),    # adjacent leading swap
        (-1, -2),  # negative dims (== (2, 3))
        (1, 1),    # degenerate: identity
    ]
    for da, db in cases:
        y = jax.block_until_ready(Transpose(da, db)(x))
        ref = jnp.swapaxes(x, da, db)
        assert y.shape == ref.shape, f"shape mismatch for dims {(da, db)}"
        assert bool(jnp.array_equal(y, ref)), f"value mismatch for dims {(da, db)}"
    print("KERNEL_OK")
</pallas_src>

<mosaic_0001>
module attributes {stable_mosaic.version = 11 : i64} {
  func.func @kernel(%arg0: i32, %arg1: i32, %arg2: i32, %arg3: i32, %arg4: memref<2x4x16x16xf32, #tpu.memory_space<vmem>>, %arg5: memref<2x16x4x16xf32, #tpu.memory_space<vmem>>) attributes {dimension_semantics = [#tpu.dimension_semantics<parallel>, #tpu.dimension_semantics<parallel>, #tpu.dimension_semantics<parallel>, #tpu.dimension_semantics<parallel>], iteration_bounds = array<i64: 1, 1, 1, 1>, scalar_prefetch = 0 : i64, scratch_operands = 0 : i64, tpu.core_type = #tpu.core_type<tc>, window_params = [{transform_indices = @transform_0, window_bounds = array<i64: 2, 4, 16, 16>}, {transform_indices = @transform_1, window_bounds = array<i64: 2, 16, 4, 16>}]} {
    %c0 = arith.constant 0 : index
    %c0_0 = arith.constant 0 : index
    %c0_1 = arith.constant 0 : index
    %c0_2 = arith.constant 0 : index
    %0 = vector.load %arg4[%c0, %c0_0, %c0_1, %c0_2] : memref<2x4x16x16xf32, #tpu.memory_space<vmem>>, vector<2x4x16x16xf32>
    %1 = tpu.transpose %0, [0, 2, 1, 3] : vector<2x4x16x16xf32> -> vector<2x16x4x16xf32>
    %c0_3 = arith.constant 0 : index
    %c0_4 = arith.constant 0 : index
    %c0_5 = arith.constant 0 : index
    %c0_6 = arith.constant 0 : index
    %2 = vector.load %arg5[%c0_3, %c0_4, %c0_5, %c0_6] : memref<2x16x4x16xf32, #tpu.memory_space<vmem>>, vector<2x16x4x16xf32>
    tpu.vector_store %arg5[%c0_3, %c0_4, %c0_5, %c0_6], %1 {strides = array<i32>} : memref<2x16x4x16xf32, #tpu.memory_space<vmem>>, vector<2x16x4x16xf32>,
    return
  }
  func.func @transform_0(%arg0: i32, %arg1: i32, %arg2: i32, %arg3: i32) -> (i32, i32, i32, i32) {
    %c0_i32 = arith.constant 0 : i32
    return %arg0, %arg3, %arg2, %arg1 : i32, i32, i32, i32
  }
  func.func @transform_1(%arg0: i32, %arg1: i32, %arg2: i32, %arg3: i32) -> (i32, i32, i32, i32) {
    %c0_i32 = arith.constant 0 : i32
    return %arg0, %arg2, %arg3, %arg1 : i32, i32, i32, i32
  }
}

</mosaic_0001>

<bundles_post_ra>
// kernel: tpu_custom_call.1
= control target key start
LH: loop header
LB: loop body
LE: loop exit
PB: predicated region body
PF: predicated region fallthrough
CT: control target
= control target key end

     0   :  { %6 = vsyncpa [#allocation3], 0  ;;  %s561_s0 = inlined_call_operand.hbm [shape: f32[2,4,16,16], index: 0, kind: input, shape index: {}]   ;;  %s562_s1 = inlined_call_operand.hbm [shape: f32[2,16,4,16], index: 1, kind: output, shape index: {}]  }
   0x1   :  { %7 = vsyncpa [#allocation4], 0  ;;  %s418_s6 = smov [#allocation2]   ;;  %s370_s10 = scalar_lea.hbm %s561_s0, 2048 }
   0x2   :  { %s13_s7 = sshll.u32 %s418_s6, 4  ;;  %p371_p0 = scmp.ne.s32.totalorder %s561_s0, %s370_s10  ;;  %s14_s7 = int_to_ptr.vmem [resolvable:$true] %s13_s7 }
   0x3   :  { %p374_p1 = scmp.lt.u32.totalorder %s370_s10, %s561_s0 }
   0x5   :  { %p376_p2 = pnand %p374_p1, %p371_p0 }
   0x7   :  { %379 = shalt.err (!%p376_p2)
}
   0x8   :  { %s380_s15 = scalar_lea.vmem %s14_s7, 2048  ;;  %p385_p4 = scmp.lt.s32.totalorder %s14_s7, %s14_s7 }
   0x9   :  { %p381_p3 = scmp.ne.s32.totalorder %s14_s7, %s380_s15  ;;  %p386_p5 = scmp.lt.s32.totalorder %s380_s15, %s380_s15 }
   0xb   :  { %p387_p6 = por %p386_p5, %p385_p4 }
   0xd   :  { %p388_p7 = pnand %p387_p6, %p381_p3 }
   0xf   :  { %391 = shalt.err (!%p388_p7)
}
  0x10   :  { %s419_s16 = smov 128   ;;  %s420_s17 = smov 8  }
  0x11   :  { %19 = dma.hbm_to_vmem [thread:$0]  %s561_s0, 2048, %s14_s7, [#allocation3], %s419_s16, %s419_s16, %s420_s17  }
  0x12   :  { %414 = dma.done.wait [#allocation3], 2048  }
  0x13   :  { %415 = vsyncadd [#allocation3], 4294965248  ;;  %v44_v0 = vlaneseq  ;;  %v421_v1 = vmov 1983009808   ;;  %v422_v3 = vmov 1934713408  }
  0x14   :  { %v42_v2 = vunpack.c.l.s4 %v421_v1  ;;  %v74_v4 = vunpack.c.l.s4 %v422_v3  ;;  %v23_v9 = vld [vmem:[#allocation2] sm:$0xff]  ;;  %v25_v10 = vld [vmem:[#allocation2 + $0x10] sm:$0xff]  ;;  %vm311_vm0 = vcmask 125952   ;;  %v24_v15 = vld [vmem:[#allocation2 + $0x8] sm:$0xff]  ;;  %v423_v55 = vmov 0.0   ;;  %s424_s0 = smov [#allocation5]  }
  0x15   :  { %v45_v5 = vshrl.u32 %v44_v0, 7  ;;  %v27_v11 = vld [vmem:[#allocation2 + $0x20] sm:$0xff]  ;;  %v29_v12 = vld [vmem:[#allocation2 + $0x30] sm:$0xff]  ;;  %v26_v16 = vld [vmem:[#allocation2 + $0x18] sm:$0xff]  ;;  %s349_s20 = sshll.u32 %s424_s0, 4  ;;  %s350_s20 = int_to_ptr.vmem [resolvable:$true] %s349_s20 }
  0x16   :  { %v43_v6 = vunpack.c.0.s8 %v42_v2  ;;  %v75_v7 = vunpack.c.0.s8 %v74_v4  ;;  %v39_v13 = vcombine.low %v23_v9, %v27_v11  ;;  %v40_v14 = vcombine.high %v23_v9, %v27_v11  ;;  %v28_v20 = vld [vmem:[#allocation2 + $0x28] sm:$0xff]  ;;  %v30_v21 = vld [vmem:[#allocation2 + $0x38] sm:$0xff]  ;;  %v453_v22 = vld [vmem:[#allocation2 + $0x40] sm:$0xff]  ;;  %s392_s21 = scalar_lea.vmem %s350_s20, 2048  ;;  %p397_p9 = scmp.lt.s32.totalorder %s350_s20, %s350_s20 }
  0x17   :  { %v55_v17 = vcombine.low %v25_v10, %v29_v12  ;;  %v56_v19 = vcombine.high %v25_v10, %v29_v12  ;;  %v107_v25 = vcombine.low %v24_v15, %v28_v20  ;;  %v123_v26 = vcombine.low %v26_v16, %v30_v21  ;;  %v457_v27 = vld [vmem:[#allocation2 + $0x50] sm:$0xff]  ;;  %v459_v28 = vld [vmem:[#allocation2 + $0x60] sm:$0xff]  ;;  %v32_v54 = vld [vmem:[#allocation2 + $0x48] sm:$0xff]  ;;  %p393_p8 = scmp.ne.s32.totalorder %s350_s20, %s392_s21  ;;  %p398_p10 = scmp.lt.s32.totalorder %s392_s21, %s392_s21 }
  0x18   :  { %v449_v8 = vsub.s32 %v43_v6, %v45_v5  ;;  %v451_v18 = vsub.s32 %v75_v7, %v45_v5  ;;  %v461_v29 = vld [vmem:[#allocation2 + $0x70] sm:$0xff]  ;;  %v108_v32 = vcombine.high %v24_v15, %v28_v20  ;;  %v124_v33 = vcombine.high %v26_v16, %v30_v21  ;;  %v34_v60 = vld [vmem:[#allocation2 + $0x58] sm:$0xff]  ;;  %v36_v61 = vld [vmem:[#allocation2 + $0x68] sm:$0xff] }
  0x19   :  { %v175_v36 = vcombine.low %v453_v22, %v459_v28  ;;  %v191_v37 = vcombine.low %v457_v27, %v461_v29  ;;  %v38_v62 = vld [vmem:[#allocation2 + $0x78] sm:$0xff]  ;;  %v176_v5 = vcombine.high %v453_v22, %v459_v28  ;;  %v192_v6 = vcombine.high %v457_v27, %v461_v29  ;;  %p399_p11 = por %p398_p10, %p397_p9 }
  0x1a   :  { %v47_v23 = vrot.slane %v39_v13, %v449_v8  ;;  %v54_v24 = vrot.slane %v40_v14, %v449_v8  ;;  %v63_v30 = vrot.slane %v55_v17, %v449_v8  ;;  %v70_v31 = vrot.slane %v56_v19, %v449_v8 }
  0x1b   :  { %v115_v34 = vrot.slane %v107_v25, %v449_v8  ;;  %v131_v35 = vrot.slane %v123_v26, %v449_v8  ;;  %v122_v44 = vrot.slane %v108_v32, %v449_v8  ;;  %v138_v45 = vrot.slane %v124_v33, %v449_v8  ;;  %p400_p12 = pnand %p399_p11, %p393_p8 }
  0x1c   :  { %v71_v38 = vcombine.low %v47_v23, %v63_v30  ;;  %v72_v39 = vcombine.high %v47_v23, %v63_v30  ;;  %v87_v40 = vcombine.low %v54_v24, %v70_v31  ;;  %v88_v41 = vcombine.high %v54_v24, %v70_v31 }
  0x1d   :  { %v139_v42 = vcombine.low %v115_v34, %v131_v35  ;;  %v140_v43 = vcombine.high %v115_v34, %v131_v35  ;;  %v155_v52 = vcombine.low %v122_v44, %v138_v45  ;;  %v156_v53 = vcombine.high %v122_v44, %v138_v45 }
  0x1e   :  { %v79_v46 = vrot.slane %v71_v38, %v451_v18  ;;  %v86_v47 = vrot.slane %v72_v39, %v451_v18  ;;  %v95_v48 = vrot.slane %v87_v40, %v451_v18  ;;  %v102_v49 = vrot.slane %v88_v41, %v451_v18 }
  0x1f   :  { %v147_v50 = vrot.slane %v139_v42, %v451_v18  ;;  %v154_v51 = vrot.slane %v140_v43, %v451_v18  ;;  %v163_v1 = vrot.slane %v155_v52, %v451_v18  ;;  %v170_v2 = vrot.slane %v156_v53, %v451_v18 }
  0x20   :  { %312 = vst.msk [vmem:[#allocation5] sm:$0xf] %vm311_vm0, %v79_v46  ;;  %v103_v56 = vcombine.high %v79_v46, %v423_v55  ;;  %314 = vst.msk [vmem:[#allocation5 + $0x8] sm:$0xf] %vm311_vm0, %v86_v47  ;;  %v104_v57 = vcombine.high %v86_v47, %v423_v55  ;;  %v105_v58 = vcombine.high %v95_v48, %v423_v55 }
  0x21   :  { %316 = vst.msk [vmem:[#allocation5 + $0x10] sm:$0xf] %vm311_vm0, %v95_v48  ;;  %318 = vst.msk [vmem:[#allocation5 + $0x18] sm:$0xf] %vm311_vm0, %v102_v49  ;;  %v106_v59 = vcombine.high %v102_v49, %v423_v55  ;;  %v171_v63 = vcombine.high %v147_v50, %v423_v55  ;;  %v172_v0 = vcombine.high %v154_v51, %v423_v55 }
  0x22   :  { %320 = vst.msk [vmem:[#allocation5 + $0x20] sm:$0xf] %vm311_vm0, %v147_v50  ;;  %322 = vst.msk [vmem:[#allocation5 + $0x28] sm:$0xf] %vm311_vm0, %v154_v51  ;;  %v183_v3 = vrot.slane %v175_v36, %v449_v8  ;;  %v199_v4 = vrot.slane %v191_v37, %v449_v8  ;;  %v173_v7 = vcombine.high %v163_v1, %v423_v55 }
  0x23   :  { %313 = vst.msk [vmem:[#allocation5 + $0x4] sm:$0xf] %vm311_vm0, %v103_v56  ;;  %315 = vst.msk [vmem:[#allocation5 + $0xc] sm:$0xf] %vm311_vm0, %v104_v57  ;;  %v174_v9 = vcombine.high %v170_v2, %v423_v55  ;;  %v243_v10 = vcombine.low %v32_v54, %v36_v61  ;;  %v259_v11 = vcombine.low %v34_v60, %v38_v62 }
  0x24   :  { %317 = vst.msk [vmem:[#allocation5 + $0x14] sm:$0xf] %vm311_vm0, %v105_v58  ;;  %319 = vst.msk [vmem:[#allocation5 + $0x1c] sm:$0xf] %vm311_vm0, %v106_v59  ;;  %v207_v12 = vcombine.low %v183_v3, %v199_v4  ;;  %v208_v13 = vcombine.high %v183_v3, %v199_v4  ;;  %v190_v14 = vrot.slane %v176_v5, %v449_v8 }
  0x25   :  { %321 = vst.msk [vmem:[#allocation5 + $0x24] sm:$0xf] %vm311_vm0, %v171_v63  ;;  %323 = vst.msk [vmem:[#allocation5 + $0x2c] sm:$0xf] %vm311_vm0, %v172_v0  ;;  %v206_v15 = vrot.slane %v192_v6, %v449_v8  ;;  %v251_v16 = vrot.slane %v243_v10, %v449_v8  ;;  %v267_v17 = vrot.slane %v259_v11, %v449_v8 }
  0x26   :  { %324 = vst.msk [vmem:[#allocation5 + $0x30] sm:$0xf] %vm311_vm0, %v163_v1  ;;  %326 = vst.msk [vmem:[#allocation5 + $0x38] sm:$0xf] %vm311_vm0, %v170_v2  ;;  %v244_v19 = vcombine.high %v32_v54, %v36_v61  ;;  %v260_v20 = vcombine.high %v34_v60, %v38_v62  ;;  %v215_v21 = vrot.slane %v207_v12, %v451_v18 }
  0x27   :  { %325 = vst.msk [vmem:[#allocation5 + $0x34] sm:$0xf] %vm311_vm0, %v173_v7  ;;  %327 = vst.msk [vmem:[#allocation5 + $0x3c] sm:$0xf] %vm311_vm0, %v174_v9  ;;  %v222_v22 = vrot.slane %v208_v13, %v451_v18  ;;  %v223_v23 = vcombine.low %v190_v14, %v206_v15  ;;  %v224_v24 = vcombine.high %v190_v14, %v206_v15 }
  0x28   :  { %v275_v25 = vcombine.low %v251_v16, %v267_v17  ;;  %v276_v26 = vcombine.high %v251_v16, %v267_v17  ;;  %v258_v27 = vrot.slane %v244_v19, %v449_v8  ;;  %v274_v28 = vrot.slane %v260_v20, %v449_v8  ;;  %328 = vst.msk [vmem:[#allocation5 + $0x40] sm:$0xf] %vm311_vm0, %v215_v21 }
  0x29   :  { %v239_v29 = vcombine.high %v215_v21, %v423_v55  ;;  %330 = vst.msk [vmem:[#allocation5 + $0x48] sm:$0xf] %vm311_vm0, %v222_v22  ;;  %v240_v30 = vcombine.high %v222_v22, %v423_v55  ;;  %v231_v31 = vrot.slane %v223_v23, %v451_v18  ;;  %v238_v32 = vrot.slane %v224_v24, %v451_v18 }
  0x2a   :  { %v283_v33 = vrot.slane %v275_v25, %v451_v18  ;;  %v290_v34 = vrot.slane %v276_v26, %v451_v18  ;;  %v291_v35 = vcombine.low %v258_v27, %v274_v28  ;;  %v292_v36 = vcombine.high %v258_v27, %v274_v28 }
  0x2b   :  { %329 = vst.msk [vmem:[#allocation5 + $0x44] sm:$0xf] %vm311_vm0, %v239_v29  ;;  %331 = vst.msk [vmem:[#allocation5 + $0x4c] sm:$0xf] %vm311_vm0, %v240_v30  ;;  %v241_v8 = vcombine.high %v231_v31, %v423_v55  ;;  %v242_v37 = vcombine.high %v238_v32, %v423_v55 }
  0x2c   :  { %332 = vst.msk [vmem:[#allocation5 + $0x50] sm:$0xf] %vm311_vm0, %v231_v31  ;;  %334 = vst.msk [vmem:[#allocation5 + $0x58] sm:$0xf] %vm311_vm0, %v238_v32  ;;  %v307_v38 = vcombine.high %v283_v33, %v423_v55  ;;  %v308_v39 = vcombine.high %v290_v34, %v423_v55  ;;  %v299_v40 = vrot.slane %v291_v35, %v451_v18 }
  0x2d   :  { %336 = vst.msk [vmem:[#allocation5 + $0x60] sm:$0xf] %vm311_vm0, %v283_v33  ;;  %338 = vst.msk [vmem:[#allocation5 + $0x68] sm:$0xf] %vm311_vm0, %v290_v34  ;;  %v306_v41 = vrot.slane %v292_v36, %v451_v18 }
  0x2e   :  { %333 = vst.msk [vmem:[#allocation5 + $0x54] sm:$0xf] %vm311_vm0, %v241_v8  ;;  %335 = vst.msk [vmem:[#allocation5 + $0x5c] sm:$0xf] %vm311_vm0, %v242_v37  ;;  %v309_v42 = vcombine.high %v299_v40, %v423_v55 }
  0x2f   :  { %337 = vst.msk [vmem:[#allocation5 + $0x64] sm:$0xf] %vm311_vm0, %v307_v38  ;;  %339 = vst.msk [vmem:[#allocation5 + $0x6c] sm:$0xf] %vm311_vm0, %v308_v39  ;;  %v310_v43 = vcombine.high %v306_v41, %v423_v55 }
  0x30   :  { %340 = vst.msk [vmem:[#allocation5 + $0x70] sm:$0xf] %vm311_vm0, %v299_v40  ;;  %342 = vst.msk [vmem:[#allocation5 + $0x78] sm:$0xf] %vm311_vm0, %v306_v41 }
  0x31   :  { %341 = vst.msk [vmem:[#allocation5 + $0x74] sm:$0xf] %vm311_vm0, %v309_v42  ;;  %343 = vst.msk [vmem:[#allocation5 + $0x7c] sm:$0xf] %vm311_vm0, %v310_v43 }
  0x32   :  { %403 = shalt.err (!%p400_p12)
}
  0x33   :  { %s404_s24 = scalar_lea.hbm %s562_s1, 2048 }
  0x34   :  { %p405_p13 = scmp.ne.s32.totalorder %s562_s1, %s404_s24  ;;  %p408_p0 = scmp.lt.u32.totalorder %s404_s24, %s562_s1 }
  0x36   :  { %p410_p1 = pnand %p408_p0, %p405_p13 }
  0x38   :  { %413 = shalt.err (!%p410_p1)
}
  0x39   :  { %s425_s29 = smov 64   ;;  %s426_s30 = smov 4  }
  0x3a   :  { %355 = dma.vmem_to_hbm [thread:$0]  %s350_s20, 2048, %s562_s1, [#allocation4], %s425_s29, %s425_s29, %s426_s30  }
  0x3b   :  { %416 = dma.done.wait [#allocation4], 2048  }
  0x3c   :  { %417 = vsyncadd [#allocation4], 4294965248 }
  0x3d   :  { %359 = vsyncpa [#allocation3], 1 }
  0x3e   :  { %360 = vsyncpa [#allocation4], 1 }

</bundles_post_ra>
